<compile_context>
chip_gen: v7x
topology: tpu7x:2x2x1
jax: 0.10.0
libtpu: 0.0.40
codegen_flags: <defaults>
</compile_context>

<pallas_src>
import functools

import jax
import jax.numpy as jnp
import numpy as np
from jax import lax
from jax.experimental import pallas as pl
from jax.experimental.pallas import tpu as pltpu


def _gmapping_kernel(x_ref, w_ref, b_ref, out_ref, *,
                     normalize_latents, num_layers):
    """Whole mapping network in one grid step (per batch tile).

    x_ref:  (Bt, D)      input latents (f32)
    w_ref:  (L, D, D)    effective weights, bf16, VMEM-resident
    b_ref:  (L, 1, D)    effective biases, f32
    out_ref:(Bt, D)      dlatents
    """
    h = x_ref[...].astype(jnp.float32)
    if normalize_latents:
        inv = lax.rsqrt(jnp.mean(h * h, axis=1, keepdims=True) + 1e-8)
        h = h * inv

    def layer(l, h):
        w = w_ref[l]                      # (D, D) bf16 view of resident slab
        b = b_ref[l]                      # (1, D) f32
        y = jnp.dot(h.astype(jnp.bfloat16), w,
                    preferred_element_type=jnp.float32) + b
        return jnp.where(y >= 0.0, y, 0.2 * y)   # LeakyReLU(0.2)

    h = lax.fori_loop(0, num_layers, layer, h, unroll=True)
    out_ref[...] = h.astype(out_ref.dtype)


def gmapping_forward(x, weights, biases, *, normalize_latents=True,
                     dlatent_broadcast=None, block_b=None):
    """x: (B, D) f32.  weights: (L, D, D) f32.  biases: (L, 1, D) f32."""
    L, d_in, d_out = weights.shape
    B = x.shape[0]
    assert d_in == d_out, "this kernel assumes equal fmaps across layers"

    # bf16 weights feed the MXU directly; biases stay f32 for the VPU add.
    w_bf16 = weights.astype(jnp.bfloat16)
    b_f32 = biases.astype(jnp.float32)

    # Batch tiling: single tile for small B; split (and shard across TCs via
    # the "parallel" axis) when the batch is large enough to matter.
    if block_b is None:
        block_b = B if B <= 256 else 256
    if B % block_b != 0:
        block_b = B
    n_bt = B // block_b

    # Size the scoped VMEM limit from the resident slab (guards v7x, D>=512).
    itemsize = jnp.dtype(x.dtype).itemsize
    est_bytes = (2 * (w_bf16.size * 2 + b_f32.size * 4)          # dbl-buffered params
                 + 2 * 2 * block_b * d_in * itemsize             # dbl-buffered x/out
                 + 4 * block_b * d_in * 4                        # activations / temps
                 + (1 << 20))                                    # slack
    vmem_limit = int(min(max(est_bytes, 32 << 20), 60 << 20))

    kernel = functools.partial(_gmapping_kernel,
                               normalize_latents=normalize_latents,
                               num_layers=L)

    out = pl.pallas_call(
        kernel,
        out_shape=jax.ShapeDtypeStruct((B, d_out), x.dtype),
        grid_spec=pltpu.PrefetchScalarGridSpec(
            num_scalar_prefetch=0,
            grid=(n_bt,),
            in_specs=[
                pl.BlockSpec((block_b, d_in), lambda i: (i, 0)),       # x tile
                pl.BlockSpec((L, d_in, d_out), lambda i: (0, 0, 0)),   # all W
                pl.BlockSpec((L, 1, d_out), lambda i: (0, 0, 0)),      # all b
            ],
            out_specs=pl.BlockSpec((block_b, d_out), lambda i: (i, 0)),
        ),
        compiler_params=pltpu.CompilerParams(
            dimension_semantics=("parallel",),
            vmem_limit_bytes=vmem_limit),
    )(x, w_bf16, b_f32)

    if dlatent_broadcast is not None:
        # x.unsqueeze(1).expand(-1, dlatent_broadcast, -1)
        out = jnp.broadcast_to(out[:, None, :],
                               (B, dlatent_broadcast, d_out))
    return out


def make_gmapping_params(key, *, latent_size, mapping_fmaps, dlatent_size,
                         mapping_layers, lrmul=0.01, gain=np.sqrt(2.0),
                         use_wscale=True):
    """Deterministic synthetic params mirroring EqualizedLinear.__init__."""
    assert latent_size == mapping_fmaps == dlatent_size
    D = latent_size
    he_std = gain * (D ** -0.5)
    if use_wscale:
        init_std = 1.0 / lrmul
        w_mul = he_std * lrmul
    else:
        init_std = he_std / lrmul
        w_mul = lrmul
    b_mul = lrmul

    ws, bs = [], []
    for _ in range(mapping_layers):
        key, k = jax.random.split(key)
        # torch stores weight as (out, in); x @ W.T == x @ (stored as (in, out))
        w_raw = jax.random.normal(k, (D, D), dtype=jnp.float32) * init_std
        b_raw = jnp.zeros((D,), dtype=jnp.float32)
        ws.append(w_raw.T * w_mul)             # effective (in, out)
        bs.append((b_raw * b_mul)[None, :])    # effective (1, out)
    return jnp.stack(ws, axis=0), jnp.stack(bs, axis=0)


def gmapping_reference(x, weights, biases, *, normalize_latents=True,
                       dlatent_broadcast=None):
    """Pure-JAX reference mirroring the kernel arithmetic (bf16 MXU inputs,
    f32 accumulation and elementwise)."""
    w_bf16 = weights.astype(jnp.bfloat16)
    h = x.astype(jnp.float32)
    if normalize_latents:
        h = h * lax.rsqrt(jnp.mean(h * h, axis=1, keepdims=True) + 1e-8)
    for l in range(weights.shape[0]):
        h = jnp.dot(h.astype(jnp.bfloat16), w_bf16[l],
                    preferred_element_type=jnp.float32) + biases[l]
        h = jnp.where(h >= 0.0, h, 0.2 * h)
    if dlatent_broadcast is not None:
        h = jnp.broadcast_to(h[:, None, :],
                             (h.shape[0], dlatent_broadcast, h.shape[-1]))
    return h


if __name__ == "__main__":
    # Small, but consistent with the module: latent == fmaps == dlatent.
    LATENT = 128
    LAYERS = 8
    BATCH = 8
    BROADCAST = 4

    key = jax.random.PRNGKey(0)
    kx, kp = jax.random.split(key)
    x = jax.random.normal(kx, (BATCH, LATENT), dtype=jnp.float32)
    W, b = make_gmapping_params(kp, latent_size=LATENT, mapping_fmaps=LATENT,
                                dlatent_size=LATENT, mapping_layers=LAYERS)

    out = gmapping_forward(x, W, b, normalize_latents=True,
                           dlatent_broadcast=BROADCAST)
    out = jax.block_until_ready(out)

    ref = gmapping_reference(x, W, b, normalize_latents=True,
                             dlatent_broadcast=BROADCAST)
    assert out.shape == (BATCH, BROADCAST, LATENT), out.shape
    np.testing.assert_allclose(np.asarray(out), np.asarray(ref),
                               rtol=1e-2, atol=1e-2)
    print("KERNEL_OK")
</pallas_src>

<mosaic_0001>
module attributes {stable_mosaic.version = 11 : i64} {
  func.func @_gmapping_kernel(%arg0: i32, %arg1: memref<8x128xf32, #tpu.memory_space<vmem>>, %arg2: memref<8x128x128xbf16, #tpu.memory_space<vmem>>, %arg3: memref<8x1x128xf32, #tpu.memory_space<vmem>>, %arg4: memref<8x128xf32, #tpu.memory_space<vmem>>) attributes {dimension_semantics = [#tpu.dimension_semantics<parallel>], iteration_bounds = array<i64: 1>, scalar_prefetch = 0 : i64, scratch_operands = 0 : i64, tpu.core_type = #tpu.core_type<tc>, window_params = [{transform_indices = @transform_0, window_bounds = array<i64: 8, 128>}, {pipeline_mode = #tpu.pipeline_mode<synchronous>, transform_indices = @transform_1, window_bounds = array<i64: 8, 128, 128>}, {pipeline_mode = #tpu.pipeline_mode<synchronous>, transform_indices = @transform_2, window_bounds = array<i64: 8, 1, 128>}, {transform_indices = @transform_3, window_bounds = array<i64: 8, 128>}]} {
    %c0 = arith.constant 0 : index
    %c0_0 = arith.constant 0 : index
    %0 = vector.load %arg1[%c0, %c0_0] : memref<8x128xf32, #tpu.memory_space<vmem>>, vector<8x128xf32>
    %1 = arith.mulf %0, %0 : vector<8x128xf32>
    %cst = arith.constant dense<0.000000e+00> : vector<8xf32>
    %2 = vector.multi_reduction <add>, %1, %cst [1] : vector<8x128xf32> to vector<8xf32>
    %3 = vector.shape_cast %2 : vector<8xf32> to vector<8x1xf32>
    %cst_1 = arith.constant 1.280000e+02 : f32
    %4 = vector.broadcast %cst_1 : f32 to vector<8x1xf32>
    %5 = arith.divf %3, %4 : vector<8x1xf32>
    %cst_2 = arith.constant 9.99999993E-9 : f32
    %6 = vector.broadcast %cst_2 : f32 to vector<8x1xf32>
    %7 = arith.addf %5, %6 : vector<8x1xf32>
    %8 = math.rsqrt %7 : vector<8x1xf32>
    %9 = vector.broadcast %8 : vector<8x1xf32> to vector<8x128xf32>
    %10 = arith.mulf %0, %9 : vector<8x128xf32>
    %c0_i32 = arith.constant 0 : i32
    %11 = arith.index_cast %c0_i32 : i32 to index
    %c0_3 = arith.constant 0 : index
    %c0_4 = arith.constant 0 : index
    %12 = vector.load %arg2[%11, %c0_3, %c0_4] : memref<8x128x128xbf16, #tpu.memory_space<vmem>>, vector<1x128x128xbf16>
    %13 = vector.shape_cast %12 : vector<1x128x128xbf16> to vector<128x128xbf16>
    %14 = arith.index_cast %c0_i32 : i32 to index
    %c0_5 = arith.constant 0 : index
    %c0_6 = arith.constant 0 : index
    %15 = vector.load %arg3[%14, %c0_5, %c0_6] : memref<8x1x128xf32, #tpu.memory_space<vmem>>, vector<1x1x128xf32>
    %16 = vector.shape_cast %15 : vector<1x1x128xf32> to vector<1x128xf32>
    %17 = arith.truncf %10 : vector<8x128xf32> to vector<8x128xbf16>
    %cst_7 = arith.constant dense<0.000000e+00> : vector<8x128xf32>
    %18 = tpu.matmul %17, %13, %cst_7 {dimension_numbers = #tpu.dot_dimension_numbers<[1], [0], [0], [1], [0, 0, 1, 1], [], []>} : vector<8x128xbf16>, vector<128x128xbf16>, vector<8x128xf32> -> vector<8x128xf32>
    %19 = vector.broadcast %16 : vector<1x128xf32> to vector<8x128xf32>
    %20 = arith.addf %18, %19 : vector<8x128xf32>
    %cst_8 = arith.constant 0.000000e+00 : f32
    %21 = vector.broadcast %cst_8 : f32 to vector<8x128xf32>
    %22 = arith.cmpf oge, %20, %21 : vector<8x128xf32>
    %cst_9 = arith.constant 2.000000e-01 : f32
    %23 = vector.broadcast %cst_9 : f32 to vector<8x128xf32>
    %24 = arith.mulf %23, %20 : vector<8x128xf32>
    %25 = arith.select %22, %20, %24 : vector<8x128xi1>, vector<8x128xf32>
    %c1_i32 = arith.constant 1 : i32
    %26 = arith.index_cast %c1_i32 : i32 to index
    %c0_10 = arith.constant 0 : index
    %c0_11 = arith.constant 0 : index
    %27 = vector.load %arg2[%26, %c0_10, %c0_11] : memref<8x128x128xbf16, #tpu.memory_space<vmem>>, vector<1x128x128xbf16>
    %28 = vector.shape_cast %27 : vector<1x128x128xbf16> to vector<128x128xbf16>
    %29 = arith.index_cast %c1_i32 : i32 to index
    %c0_12 = arith.constant 0 : index
    %c0_13 = arith.constant 0 : index
    %30 = vector.load %arg3[%29, %c0_12, %c0_13] : memref<8x1x128xf32, #tpu.memory_space<vmem>>, vector<1x1x128xf32>
    %31 = vector.shape_cast %30 : vector<1x1x128xf32> to vector<1x128xf32>
    %32 = arith.truncf %25 : vector<8x128xf32> to vector<8x128xbf16>
    %cst_14 = arith.constant dense<0.000000e+00> : vector<8x128xf32>
    %33 = tpu.matmul %32, %28, %cst_14 {dimension_numbers = #tpu.dot_dimension_numbers<[1], [0], [0], [1], [0, 0, 1, 1], [], []>} : vector<8x128xbf16>, vector<128x128xbf16>, vector<8x128xf32> -> vector<8x128xf32>
    %34 = vector.broadcast %31 : vector<1x128xf32> to vector<8x128xf32>
    %35 = arith.addf %33, %34 : vector<8x128xf32>
    %cst_15 = arith.constant 0.000000e+00 : f32
    %36 = vector.broadcast %cst_15 : f32 to vector<8x128xf32>
    %37 = arith.cmpf oge, %35, %36 : vector<8x128xf32>
    %cst_16 = arith.constant 2.000000e-01 : f32
    %38 = vector.broadcast %cst_16 : f32 to vector<8x128xf32>
    %39 = arith.mulf %38, %35 : vector<8x128xf32>
    %40 = arith.select %37, %35, %39 : vector<8x128xi1>, vector<8x128xf32>
    %c2_i32 = arith.constant 2 : i32
    %41 = arith.index_cast %c2_i32 : i32 to index
    %c0_17 = arith.constant 0 : index
    %c0_18 = arith.constant 0 : index
    %42 = vector.load %arg2[%41, %c0_17, %c0_18] : memref<8x128x128xbf16, #tpu.memory_space<vmem>>, vector<1x128x128xbf16>
    %43 = vector.shape_cast %42 : vector<1x128x128xbf16> to vector<128x128xbf16>
    %44 = arith.index_cast %c2_i32 : i32 to index
    %c0_19 = arith.constant 0 : index
    %c0_20 = arith.constant 0 : index
    %45 = vector.load %arg3[%44, %c0_19, %c0_20] : memref<8x1x128xf32, #tpu.memory_space<vmem>>, vector<1x1x128xf32>
    %46 = vector.shape_cast %45 : vector<1x1x128xf32> to vector<1x128xf32>
    %47 = arith.truncf %40 : vector<8x128xf32> to vector<8x128xbf16>
    %cst_21 = arith.constant dense<0.000000e+00> : vector<8x128xf32>
    %48 = tpu.matmul %47, %43, %cst_21 {dimension_numbers = #tpu.dot_dimension_numbers<[1], [0], [0], [1], [0, 0, 1, 1], [], []>} : vector<8x128xbf16>, vector<128x128xbf16>, vector<8x128xf32> -> vector<8x128xf32>
    %49 = vector.broadcast %46 : vector<1x128xf32> to vector<8x128xf32>
    %50 = arith.addf %48, %49 : vector<8x128xf32>
    %cst_22 = arith.constant 0.000000e+00 : f32
    %51 = vector.broadcast %cst_22 : f32 to vector<8x128xf32>
    %52 = arith.cmpf oge, %50, %51 : vector<8x128xf32>
    %cst_23 = arith.constant 2.000000e-01 : f32
    %53 = vector.broadcast %cst_23 : f32 to vector<8x128xf32>
    %54 = arith.mulf %53, %50 : vector<8x128xf32>
    %55 = arith.select %52, %50, %54 : vector<8x128xi1>, vector<8x128xf32>
    %c3_i32 = arith.constant 3 : i32
    %56 = arith.index_cast %c3_i32 : i32 to index
    %c0_24 = arith.constant 0 : index
    %c0_25 = arith.constant 0 : index
    %57 = vector.load %arg2[%56, %c0_24, %c0_25] : memref<8x128x128xbf16, #tpu.memory_space<vmem>>, vector<1x128x128xbf16>
    %58 = vector.shape_cast %57 : vector<1x128x128xbf16> to vector<128x128xbf16>
    %59 = arith.index_cast %c3_i32 : i32 to index
    %c0_26 = arith.constant 0 : index
    %c0_27 = arith.constant 0 : index
    %60 = vector.load %arg3[%59, %c0_26, %c0_27] : memref<8x1x128xf32, #tpu.memory_space<vmem>>, vector<1x1x128xf32>
    %61 = vector.shape_cast %60 : vector<1x1x128xf32> to vector<1x128xf32>
    %62 = arith.truncf %55 : vector<8x128xf32> to vector<8x128xbf16>
    %cst_28 = arith.constant dense<0.000000e+00> : vector<8x128xf32>
    %63 = tpu.matmul %62, %58, %cst_28 {dimension_numbers = #tpu.dot_dimension_numbers<[1], [0], [0], [1], [0, 0, 1, 1], [], []>} : vector<8x128xbf16>, vector<128x128xbf16>, vector<8x128xf32> -> vector<8x128xf32>
    %64 = vector.broadcast %61 : vector<1x128xf32> to vector<8x128xf32>
    %65 = arith.addf %63, %64 : vector<8x128xf32>
    %cst_29 = arith.constant 0.000000e+00 : f32
    %66 = vector.broadcast %cst_29 : f32 to vector<8x128xf32>
    %67 = arith.cmpf oge, %65, %66 : vector<8x128xf32>
    %cst_30 = arith.constant 2.000000e-01 : f32
    %68 = vector.broadcast %cst_30 : f32 to vector<8x128xf32>
    %69 = arith.mulf %68, %65 : vector<8x128xf32>
    %70 = arith.select %67, %65, %69 : vector<8x128xi1>, vector<8x128xf32>
    %c4_i32 = arith.constant 4 : i32
    %71 = arith.index_cast %c4_i32 : i32 to index
    %c0_31 = arith.constant 0 : index
    %c0_32 = arith.constant 0 : index
    %72 = vector.load %arg2[%71, %c0_31, %c0_32] : memref<8x128x128xbf16, #tpu.memory_space<vmem>>, vector<1x128x128xbf16>
    %73 = vector.shape_cast %72 : vector<1x128x128xbf16> to vector<128x128xbf16>
    %74 = arith.index_cast %c4_i32 : i32 to index
    %c0_33 = arith.constant 0 : index
    %c0_34 = arith.constant 0 : index
    %75 = vector.load %arg3[%74, %c0_33, %c0_34] : memref<8x1x128xf32, #tpu.memory_space<vmem>>, vector<1x1x128xf32>
    %76 = vector.shape_cast %75 : vector<1x1x128xf32> to vector<1x128xf32>
    %77 = arith.truncf %70 : vector<8x128xf32> to vector<8x128xbf16>
    %cst_35 = arith.constant dense<0.000000e+00> : vector<8x128xf32>
    %78 = tpu.matmul %77, %73, %cst_35 {dimension_numbers = #tpu.dot_dimension_numbers<[1], [0], [0], [1], [0, 0, 1, 1], [], []>} : vector<8x128xbf16>, vector<128x128xbf16>, vector<8x128xf32> -> vector<8x128xf32>
    %79 = vector.broadcast %76 : vector<1x128xf32> to vector<8x128xf32>
    %80 = arith.addf %78, %79 : vector<8x128xf32>
    %cst_36 = arith.constant 0.000000e+00 : f32
    %81 = vector.broadcast %cst_36 : f32 to vector<8x128xf32>
    %82 = arith.cmpf oge, %80, %81 : vector<8x128xf32>
    %cst_37 = arith.constant 2.000000e-01 : f32
    %83 = vector.broadcast %cst_37 : f32 to vector<8x128xf32>
    %84 = arith.mulf %83, %80 : vector<8x128xf32>
    %85 = arith.select %82, %80, %84 : vector<8x128xi1>, vector<8x128xf32>
    %c5_i32 = arith.constant 5 : i32
    %86 = arith.index_cast %c5_i32 : i32 to index
    %c0_38 = arith.constant 0 : index
    %c0_39 = arith.constant 0 : index
    %87 = vector.load %arg2[%86, %c0_38, %c0_39] : memref<8x128x128xbf16, #tpu.memory_space<vmem>>, vector<1x128x128xbf16>
    %88 = vector.shape_cast %87 : vector<1x128x128xbf16> to vector<128x128xbf16>
    %89 = arith.index_cast %c5_i32 : i32 to index
    %c0_40 = arith.constant 0 : index
    %c0_41 = arith.constant 0 : index
    %90 = vector.load %arg3[%89, %c0_40, %c0_41] : memref<8x1x128xf32, #tpu.memory_space<vmem>>, vector<1x1x128xf32>
    %91 = vector.shape_cast %90 : vector<1x1x128xf32> to vector<1x128xf32>
    %92 = arith.truncf %85 : vector<8x128xf32> to vector<8x128xbf16>
    %cst_42 = arith.constant dense<0.000000e+00> : vector<8x128xf32>
    %93 = tpu.matmul %92, %88, %cst_42 {dimension_numbers = #tpu.dot_dimension_numbers<[1], [0], [0], [1], [0, 0, 1, 1], [], []>} : vector<8x128xbf16>, vector<128x128xbf16>, vector<8x128xf32> -> vector<8x128xf32>
    %94 = vector.broadcast %91 : vector<1x128xf32> to vector<8x128xf32>
    %95 = arith.addf %93, %94 : vector<8x128xf32>
    %cst_43 = arith.constant 0.000000e+00 : f32
    %96 = vector.broadcast %cst_43 : f32 to vector<8x128xf32>
    %97 = arith.cmpf oge, %95, %96 : vector<8x128xf32>
    %cst_44 = arith.constant 2.000000e-01 : f32
    %98 = vector.broadcast %cst_44 : f32 to vector<8x128xf32>
    %99 = arith.mulf %98, %95 : vector<8x128xf32>
    %100 = arith.select %97, %95, %99 : vector<8x128xi1>, vector<8x128xf32>
    %c6_i32 = arith.constant 6 : i32
    %101 = arith.index_cast %c6_i32 : i32 to index
    %c0_45 = arith.constant 0 : index
    %c0_46 = arith.constant 0 : index
    %102 = vector.load %arg2[%101, %c0_45, %c0_46] : memref<8x128x128xbf16, #tpu.memory_space<vmem>>, vector<1x128x128xbf16>
    %103 = vector.shape_cast %102 : vector<1x128x128xbf16> to vector<128x128xbf16>
    %104 = arith.index_cast %c6_i32 : i32 to index
    %c0_47 = arith.constant 0 : index
    %c0_48 = arith.constant 0 : index
    %105 = vector.load %arg3[%104, %c0_47, %c0_48] : memref<8x1x128xf32, #tpu.memory_space<vmem>>, vector<1x1x128xf32>
    %106 = vector.shape_cast %105 : vector<1x1x128xf32> to vector<1x128xf32>
    %107 = arith.truncf %100 : vector<8x128xf32> to vector<8x128xbf16>
    %cst_49 = arith.constant dense<0.000000e+00> : vector<8x128xf32>
    %108 = tpu.matmul %107, %103, %cst_49 {dimension_numbers = #tpu.dot_dimension_numbers<[1], [0], [0], [1], [0, 0, 1, 1], [], []>} : vector<8x128xbf16>, vector<128x128xbf16>, vector<8x128xf32> -> vector<8x128xf32>
    %109 = vector.broadcast %106 : vector<1x128xf32> to vector<8x128xf32>
    %110 = arith.addf %108, %109 : vector<8x128xf32>
    %cst_50 = arith.constant 0.000000e+00 : f32
    %111 = vector.broadcast %cst_50 : f32 to vector<8x128xf32>
    %112 = arith.cmpf oge, %110, %111 : vector<8x128xf32>
    %cst_51 = arith.constant 2.000000e-01 : f32
    %113 = vector.broadcast %cst_51 : f32 to vector<8x128xf32>
    %114 = arith.mulf %113, %110 : vector<8x128xf32>
    %115 = arith.select %112, %110, %114 : vector<8x128xi1>, vector<8x128xf32>
    %c7_i32 = arith.constant 7 : i32
    %116 = arith.index_cast %c7_i32 : i32 to index
    %c0_52 = arith.constant 0 : index
    %c0_53 = arith.constant 0 : index
    %117 = vector.load %arg2[%116, %c0_52, %c0_53] : memref<8x128x128xbf16, #tpu.memory_space<vmem>>, vector<1x128x128xbf16>
    %118 = vector.shape_cast %117 : vector<1x128x128xbf16> to vector<128x128xbf16>
    %119 = arith.index_cast %c7_i32 : i32 to index
    %c0_54 = arith.constant 0 : index
    %c0_55 = arith.constant 0 : index
    %120 = vector.load %arg3[%119, %c0_54, %c0_55] : memref<8x1x128xf32, #tpu.memory_space<vmem>>, vector<1x1x128xf32>
    %121 = vector.shape_cast %120 : vector<1x1x128xf32> to vector<1x128xf32>
    %122 = arith.truncf %115 : vector<8x128xf32> to vector<8x128xbf16>
    %cst_56 = arith.constant dense<0.000000e+00> : vector<8x128xf32>
    %123 = tpu.matmul %122, %118, %cst_56 {dimension_numbers = #tpu.dot_dimension_numbers<[1], [0], [0], [1], [0, 0, 1, 1], [], []>} : vector<8x128xbf16>, vector<128x128xbf16>, vector<8x128xf32> -> vector<8x128xf32>
    %124 = vector.broadcast %121 : vector<1x128xf32> to vector<8x128xf32>
    %125 = arith.addf %123, %124 : vector<8x128xf32>
    %cst_57 = arith.constant 0.000000e+00 : f32
    %126 = vector.broadcast %cst_57 : f32 to vector<8x128xf32>
    %127 = arith.cmpf oge, %125, %126 : vector<8x128xf32>
    %cst_58 = arith.constant 2.000000e-01 : f32
    %128 = vector.broadcast %cst_58 : f32 to vector<8x128xf32>
    %129 = arith.mulf %128, %125 : vector<8x128xf32>
    %130 = arith.select %127, %125, %129 : vector<8x128xi1>, vector<8x128xf32>
    %c8_i32 = arith.constant 8 : i32
    %c0_59 = arith.constant 0 : index
    %c0_60 = arith.constant 0 : index
    %131 = vector.load %arg4[%c0_59, %c0_60] : memref<8x128xf32, #tpu.memory_space<vmem>>, vector<8x128xf32>
    tpu.vector_store %arg4[%c0_59, %c0_60], %130 {strides = array<i32>} : memref<8x128xf32, #tpu.memory_space<vmem>>, vector<8x128xf32>,
    return
  }
  func.func @transform_0(%arg0: i32) -> (i32, i32) {
    %c0_i32 = arith.constant 0 : i32
    %c0_i32_0 = arith.constant 0 : i32
    return %arg0, %c0_i32 : i32, i32
  }
  func.func @transform_1(%arg0: i32) -> (i32, i32, i32) {
    %c0_i32 = arith.constant 0 : i32
    %c0_i32_0 = arith.constant 0 : i32
    %c0_i32_1 = arith.constant 0 : i32
    %c0_i32_2 = arith.constant 0 : i32
    return %c0_i32, %c0_i32_0, %c0_i32_1 : i32, i32, i32
  }
  func.func @transform_2(%arg0: i32) -> (i32, i32, i32) {
    %c0_i32 = arith.constant 0 : i32
    %c0_i32_0 = arith.constant 0 : i32
    %c0_i32_1 = arith.constant 0 : i32
    %c0_i32_2 = arith.constant 0 : i32
    return %c0_i32, %c0_i32_0, %c0_i32_1 : i32, i32, i32
  }
  func.func @transform_3(%arg0: i32) -> (i32, i32) {
    %c0_i32 = arith.constant 0 : i32
    %c0_i32_0 = arith.constant 0 : i32
    return %arg0, %c0_i32 : i32, i32
  }
}

</mosaic_0001>

<bundles_post_ra>
// kernel: tpu_custom_call.1
= control target key start
LH: loop header
LB: loop body
LE: loop exit
PB: predicated region body
PF: predicated region fallthrough
CT: control target
= control target key end

     0   :  { %8 = vsyncpa [#allocation3], 0  ;;  %s1647_s0 = inlined_call_operand.hbm [shape: f32[8,128], index: 0, kind: input, shape index: {}]   ;;  %s1648_s1 = inlined_call_operand.hbm [shape: bf16[8,128,128], index: 1, kind: input, shape index: {}]   ;;  %s1649_s2 = inlined_call_operand.hbm [shape: f32[8,1,128], index: 2, kind: input, shape index: {}]   ;;  %s1650_s3 = inlined_call_operand.hbm [shape: f32[8,128], index: 3, kind: output, shape index: {}]  }
   0x1   :  { %9 = vsyncpa [#allocation6], 0 }
   0x2   :  { %10 = vsyncpa [#allocation4], 0  ;;  %s1489_s12 = smov [#allocation5]   ;;  %s1395_s16 = scalar_lea.hbm %s1648_s1, 8192 }
   0x3   :  { %s26_s13 = sshll.u32 %s1489_s12, 4  ;;  %p1396_p0 = scmp.ne.s32.totalorder %s1648_s1, %s1395_s16  ;;  %s27_s13 = int_to_ptr.vmem [resolvable:$true] %s26_s13 }
   0x4   :  { %p1399_p1 = scmp.lt.u32.totalorder %s1395_s16, %s1648_s1 }
   0x6   :  { %p1401_p2 = pnand %p1399_p1, %p1396_p0 }
   0x8   :  { %1404 = shalt.err (!%p1401_p2)
}
   0x9   :  { %s1405_s21 = scalar_lea.vmem %s27_s13, 8192  ;;  %p1410_p4 = scmp.lt.s32.totalorder %s27_s13, %s27_s13 }
   0xa   :  { %p1406_p3 = scmp.ne.s32.totalorder %s27_s13, %s1405_s21  ;;  %p1411_p5 = scmp.lt.s32.totalorder %s1405_s21, %s1405_s21 }
   0xc   :  { %p1412_p6 = por %p1411_p5, %p1410_p4 }
   0xe   :  { %p1413_p7 = pnand %p1412_p6, %p1406_p3 }
  0x10   :  { %1416 = shalt.err (!%p1413_p7)
}
  0x11   :  { %s1490_s22 = smov 64   ;;  %s1491_s23 = smov 4  }
  0x12   :  { %32 = dma.hbm_to_vmem [thread:$0]  %s1648_s1, 8192, %s27_s13, [#allocation6], %s1490_s22, %s1490_s22, %s1491_s23  }
  0x13   :  { %s1492_s26 = smov [#allocation2]   ;;  %s1493_s28 = smov [#allocation7]  }
  0x14   :  { %s17_s27 = sshll.u32 %s1492_s26, 4  ;;  %s38_s29 = sshll.u32 %s1493_s28, 4  ;;  %s18_s27 = int_to_ptr.vmem [resolvable:$true] %s17_s27  ;;  %s39_s29 = int_to_ptr.vmem [resolvable:$true] %s38_s29 }
  0x15   :  { %s1417_s5 = scalar_lea.hbm %s1647_s0, 128 }
  0x16   :  { %p1418_p8 = scmp.ne.s32.totalorder %s1647_s0, %s1417_s5  ;;  %p1421_p9 = scmp.lt.u32.totalorder %s1417_s5, %s1647_s0 }
  0x18   :  { %p1423_p10 = pnand %p1421_p9, %p1418_p8 }
  0x1a   :  { %1426 = shalt.err (!%p1423_p10)
}
  0x1b   :  { %s1427_s1 = scalar_lea.vmem %s18_s27, 128  ;;  %p1432_p12 = scmp.lt.s32.totalorder %s18_s27, %s18_s27 }
  0x1c   :  { %p1428_p11 = scmp.ne.s32.totalorder %s18_s27, %s1427_s1  ;;  %p1433_p13 = scmp.lt.s32.totalorder %s1427_s1, %s1427_s1 }
  0x1e   :  { %p1434_p0 = por %p1433_p13, %p1432_p12 }
  0x20   :  { %p1435_p1 = pnand %p1434_p0, %p1428_p11 }
  0x22   :  { %1438 = shalt.err (!%p1435_p1)
}
  0x23   :  { %20 = dma.hbm_to_vmem [thread:$0]  %s1647_s0, 128, %s18_s27, [#allocation3]  }
  0x24   :  { %s1439_s14 = scalar_lea.hbm %s1649_s2, 128 }
  0x25   :  { %p1440_p2 = scmp.ne.s32.totalorder %s1649_s2, %s1439_s14  ;;  %p1443_p3 = scmp.lt.u32.totalorder %s1439_s14, %s1649_s2 }
  0x27   :  { %p1445_p4 = pnand %p1443_p3, %p1440_p2 }
  0x29   :  { %1448 = shalt.err (!%p1445_p4)
}
  0x2a   :  { %s1449_s19 = scalar_lea.vmem %s39_s29, 128  ;;  %p1454_p6 = scmp.lt.s32.totalorder %s39_s29, %s39_s29 }
  0x2b   :  { %p1450_p5 = scmp.ne.s32.totalorder %s39_s29, %s1449_s19  ;;  %p1455_p7 = scmp.lt.s32.totalorder %s1449_s19, %s1449_s19 }
  0x2d   :  { %p1456_p8 = por %p1455_p7, %p1454_p6 }
  0x2f   :  { %p1457_p9 = pnand %p1456_p8, %p1450_p5 }
  0x31   :  { %1460 = shalt.err (!%p1457_p9)
}
  0x32   :  { %s1494_s0 = smov 16   ;;  %s1495_s20 = smov 1  }
  0x33   :  { %44 = dma.hbm_to_vmem [thread:$0]  %s1649_s2, 128, %s39_s29, [#allocation6], %s1494_s0, %s1494_s0, %s1495_s20  }
  0x34   :  { %1483 = dma.done.wait [#allocation3], 128  }
  0x35   :  { %1484 = vsyncadd [#allocation3], 4294967168 }
  0x36   :  { %1485 = dma.done.wait [#allocation6], 8320  }
  0x37   :  { %1486 = vsyncadd [#allocation6], 4294958976  ;;  %v1496_v0 = vmov 0.0   ;;  %v55_v1 = vld [vmem:[#allocation2] sm:$0xff]  ;;  %v1329_v3 = vld [vmem:[#allocation5] sm:$0xff]   ;;  %vm1497_vm0 = vmmov 0  }
  0x38   :  { %1159 = vmatprep.subr.bf16.mxu0 %v1496_v0  ;;  %1179 = vmatprep.subr.bf16.mxu1 %v1496_v0  ;;  %v56_v2 = vmul.f32 %v55_v1, %v55_v1  ;;  %v1330_v4 = vld [vmem:[#allocation5 + $0x8] sm:$0xff]   ;;  %v1331_v5 = vld [vmem:[#allocation5 + $0x10] sm:$0xff]   ;;  %v1332_v6 = vld [vmem:[#allocation5 + $0x18] sm:$0xff]   ;;  %s1498_s2 = smov [#allocation8]  }
  0x39   :  { %1160 = vmatpush3.bf16.msra.mxu0 %v1329_v3  ;;  %v1333_v7 = vld [vmem:[#allocation5 + $0x20] sm:$0xff]   ;;  %v1334_v8 = vld [vmem:[#allocation5 + $0x28] sm:$0xff]   ;;  %1175 = vmatprep.mubr.msk.bf16.mxu0 %vm1497_vm0, %v1496_v0  ;;  %v1335_v9 = vld [vmem:[#allocation5 + $0x30] sm:$0xff]   ;;  %s1005_s23 = sshll.u32 %s1498_s2, 4  ;;  %s1006_s23 = int_to_ptr.vmem [resolvable:$true] %s1005_s23 }
  0x3a   :  { %57 = vadd.xlane.f32.xlu0 %v56_v2  ;;  %1161 = vmatprep.subr.bf16.mxu0 %v1496_v0  ;;  %v1336_v10 = vld [vmem:[#allocation5 + $0x38] sm:$0xff]   ;;  %v1337_v11 = vld [vmem:[#allocation5 + $0x40] sm:$0xff]   ;;  %v1338_v12 = vld [vmem:[#allocation5 + $0x48] sm:$0xff]   ;;  %s1461_s24 = scalar_lea.vmem %s1006_s23, 128  ;;  %p1466_p11 = scmp.lt.s32.totalorder %s1006_s23, %s1006_s23 }
  0x3b   :  { %1195 = vmatprep.mubr.msk.bf16.mxu1 %vm1497_vm0, %v1496_v0  ;;  %1180 = vmatpush3.bf16.msra.mxu1 %v1337_v11  ;;  %v1339_v13 = vld [vmem:[#allocation5 + $0x50] sm:$0xff]   ;;  %v1340_v14 = vld [vmem:[#allocation5 + $0x58] sm:$0xff]   ;;  %v1341_v15 = vld [vmem:[#allocation5 + $0x60] sm:$0xff]   ;;  %p1462_p10 = scmp.ne.s32.totalorder %s1006_s23, %s1461_s24  ;;  %p1467_p12 = scmp.lt.s32.totalorder %s1461_s24, %s1461_s24 }
  0x3c   :  { %1181 = vmatprep.subr.bf16.mxu1 %v1496_v0  ;;  %v1342_v16 = vld [vmem:[#allocation5 + $0x68] sm:$0xff]   ;;  %v1343_v23 = vld [vmem:[#allocation5 + $0x70] sm:$0xff]   ;;  %v1344_v24 = vld [vmem:[#allocation5 + $0x78] sm:$0xff]  }
  0x3d   :  { %1162 = vmatpush3.bf16.msra.mxu0 %v1330_v4  ;;  %v1345_v25 = vld [vmem:[#allocation5 + $0x80] sm:$0xff]   ;;  %v1346_v26 = vld [vmem:[#allocation5 + $0x88] sm:$0xff]   ;;  %v1347_v27 = vld [vmem:[#allocation5 + $0x90] sm:$0xff]   ;;  %p1468_p13 = por %p1467_p12, %p1466_p11 }
  0x3e   :  { %1163 = vmatprep.subr.bf16.mxu0 %v1496_v0  ;;  %v1348_v28 = vld [vmem:[#allocation5 + $0x98] sm:$0xff]   ;;  %v1349_v29 = vld [vmem:[#allocation5 + $0xa0] sm:$0xff]   ;;  %v1350_v30 = vld [vmem:[#allocation5 + $0xa8] sm:$0xff]  }
  0x3f   :  { %1182 = vmatpush3.bf16.msra.mxu1 %v1338_v12  ;;  %v1015_v31 = vld [vmem:[#allocation7] ss:$0 sm:$0xff]  ;;  %v1351_v40 = vld [vmem:[#allocation5 + $0xb0] sm:$0xff]   ;;  %v1352_v41 = vld [vmem:[#allocation5 + $0xb8] sm:$0xff]   ;;  %p1469_p0 = pnand %p1468_p13, %p1462_p10 }
  0x40   :  { %1183 = vmatprep.subr.bf16.mxu1 %v1496_v0  ;;  %v1353_v42 = vld [vmem:[#allocation5 + $0xc0] sm:$0xff]   ;;  %v1354_v43 = vld [vmem:[#allocation5 + $0xc8] sm:$0xff]   ;;  %v1355_v44 = vld [vmem:[#allocation5 + $0xd0] sm:$0xff]  }
  0x41   :  { %1164 = vmatpush3.bf16.msra.mxu0 %v1331_v5  ;;  %v1356_v45 = vld [vmem:[#allocation5 + $0xd8] sm:$0xff]   ;;  %v1357_v46 = vld [vmem:[#allocation5 + $0xe0] sm:$0xff]   ;;  %v1358_v47 = vld [vmem:[#allocation5 + $0xe8] sm:$0xff]  }
  0x42   :  { %1165 = vmatprep.subr.bf16.mxu0 %v1496_v0  ;;  %v1024_v48 = vld [vmem:[#allocation7 + $0x1] ss:$0 sm:$0xff]  ;;  %v1359_v57 = vld [vmem:[#allocation5 + $0xf0] sm:$0xff]   ;;  %v1360_v58 = vld [vmem:[#allocation5 + $0xf8] sm:$0xff]  }
  0x43   :  { %1184 = vmatpush3.bf16.msra.mxu1 %v1339_v13  ;;  %v1361_v59 = vld [vmem:[#allocation5 + $0x100] sm:$0xff]   ;;  %v1362_v60 = vld [vmem:[#allocation5 + $0x108] sm:$0xff]   ;;  %v1363_v61 = vld [vmem:[#allocation5 + $0x110] sm:$0xff]  }
  0x44   :  { %1185 = vmatprep.subr.bf16.mxu1 %v1496_v0  ;;  %v1364_v62 = vld [vmem:[#allocation5 + $0x118] sm:$0xff]   ;;  %v1365_v63 = vld [vmem:[#allocation5 + $0x120] sm:$0xff]   ;;  %v1367_v11 = vld [vmem:[#allocation5 + $0x130] sm:$0xff]  }
  0x45   :  { %1166 = vmatpush3.bf16.msra.mxu0 %v1332_v6  ;;  %v1033_v2 = vld [vmem:[#allocation7 + $0x2] ss:$0 sm:$0xff]  ;;  %v1368_v12 = vld [vmem:[#allocation5 + $0x138] sm:$0xff]  }
  0x46   :  { %1167 = vmatprep.subr.bf16.mxu0 %v1496_v0  ;;  %v1369_v13 = vld [vmem:[#allocation5 + $0x140] sm:$0xff]  }
  0x47   :  { %1186 = vmatpush3.bf16.msra.mxu1 %v1340_v14  ;;  %v1370_v14 = vld [vmem:[#allocation5 + $0x148] sm:$0xff]  }
  0x48   :  { %1187 = vmatprep.subr.bf16.mxu1 %v1496_v0 }
  0x49   :  { %1168 = vmatpush3.bf16.msra.mxu0 %v1333_v7 }
  0x4a   :  { %1169 = vmatprep.subr.bf16.mxu0 %v1496_v0 }
  0x4b   :  { %1188 = vmatpush3.bf16.msra.mxu1 %v1341_v15  ;;  %v1371_v15 = vld [vmem:[#allocation5 + $0x150] sm:$0xff]  }
  0x4c   :  { %1189 = vmatprep.subr.bf16.mxu1 %v1496_v0 }
  0x4d   :  { %1170 = vmatpush3.bf16.msra.mxu0 %v1334_v8 }
  0x4e   :  { %1171 = vmatprep.subr.bf16.mxu0 %v1496_v0 }
  0x4f   :  { %1190 = vmatpush3.bf16.msra.mxu1 %v1342_v16  ;;  %v1372_v16 = vld [vmem:[#allocation5 + $0x158] sm:$0xff]  }
  0x50   :  { %1191 = vmatprep.subr.bf16.mxu1 %v1496_v0 }
  0x51   :  { %1172 = vmatpush3.bf16.msra.mxu0 %v1335_v9 }
  0x52   :  { %1173 = vmatprep.subr.bf16.mxu0 %v1496_v0 }
  0x53   :  { %1192 = vmatpush3.bf16.msra.mxu1 %v1343_v23 }
  0x54   :  { %1193 = vmatprep.subr.bf16.mxu1 %v1496_v0 }
  0x55   :  { %1174 = vmatpush3.bf16.msra.mxu0 %v1336_v10 }
  0x56   :  { %1199 = vmatprep.subr.bf16.mxu0 %v1496_v0 }
  0x57   :  { %1194 = vmatpush3.bf16.msra.mxu1 %v1344_v24 }
  0x58   :  { %1219 = vmatprep.subr.bf16.mxu1 %v1496_v0 }
  0xc7   :  { %v58_v17 = vpop.xlane.xlu0 %57 }
  0xc8   :  { %v60_v18 = vmul.f32 0.0078125, %v58_v17  ;;  %v1373_v17 = vld [vmem:[#allocation5 + $0x160] sm:$0xff]  }
  0xca   :  { %v61_v19 = vadd.f32 1e-08, %v60_v18  ;;  %v1374_v18 = vld [vmem:[#allocation5 + $0x168] sm:$0xff]  }
  0xcc   :  { %1393 = vrsqrt.f32 %v61_v19  ;;  %v1042_v19 = vld [vmem:[#allocation7 + $0x3] ss:$0 sm:$0xff] }
  0xd6   :  { %v1394_v20 = vpop.eup %1393 }
  0xd7   :  { %v63_v21 = vmul.f32 %v1394_v20, %v55_v1  ;;  %v1366_v1 = vld [vmem:[#allocation5 + $0x128] sm:$0xff]  }
  0xd9   :  { %v81_v22 = vpack.c.bf16 %v63_v21, %v63_v21 }
  0xdb   :  { %1176 = vmatmul.mubr.bf16.vlgmr.msra.gmra.mrb[0].mxu0 %v81_v22 }
  0xdc   :  { %1215 = vmatprep.mubr.msk.bf16.mxu0 %vm1497_vm0, %v1496_v0  ;;  %1200 = vmatpush3.bf16.msra.mxu0 %v1345_v25 }
  0xdd   :  { %1201 = vmatprep.subr.bf16.mxu0 %v1496_v0 }
  0xe0   :  { %1202 = vmatpush3.bf16.msra.mxu0 %v1346_v26 }
  0xe1   :  { %1203 = vmatprep.subr.bf16.mxu0 %v1496_v0 }
  0xe4   :  { %1204 = vmatpush3.bf16.msra.mxu0 %v1347_v27 }
  0xe5   :  { %1205 = vmatprep.subr.bf16.mxu0 %v1496_v0 }
  0xe8   :  { %1206 = vmatpush3.bf16.msra.mxu0 %v1348_v28  ;;  %v1375_v28 = vld [vmem:[#allocation5 + $0x170] sm:$0xff]  }
  0xe9   :  { %1207 = vmatprep.subr.bf16.mxu0 %v1496_v0 }
  0xec   :  { %1208 = vmatpush3.bf16.msra.mxu0 %v1349_v29  ;;  %v1376_v29 = vld [vmem:[#allocation5 + $0x178] sm:$0xff]  }
  0xed   :  { %1209 = vmatprep.subr.bf16.mxu0 %v1496_v0 }
  0xf0   :  { %1210 = vmatpush3.bf16.msra.mxu0 %v1350_v30  ;;  %v1377_v30 = vld [vmem:[#allocation5 + $0x180] sm:$0xff]  }
  0xf1   :  { %1211 = vmatprep.subr.bf16.mxu0 %v1496_v0 }
  0xf4   :  { %1212 = vmatpush3.bf16.msra.mxu0 %v1351_v40 }
  0xf5   :  { %1213 = vmatprep.subr.bf16.mxu0 %v1496_v0 }
  0xf8   :  { %1214 = vmatpush3.bf16.msra.mxu0 %v1352_v41 }
  0xf9   :  { %1239 = vmatprep.subr.bf16.mxu0 %v1496_v0 }
 0x1ae   :  { %v170_v32 = vpop.f32.mrb[0].mxu0 }
 0x1af   :  { %v171_v33 = vadd.f32 %v1015_v31, %v170_v32  ;;  %v1177_v34 = vpop.f32.mrb[1].mxu0  ;;  %v1378_v31 = vld [vmem:[#allocation5 + $0x188] sm:$0xff]   ;;  %v1379_v32 = vld [vmem:[#allocation5 + $0x190] sm:$0xff]  }
 0x1b0   :  { %v173_v35 = vpop.f32.mrb[2].mxu0  ;;  %v1381_v34 = vld [vmem:[#allocation5 + $0x1a0] sm:$0xff]  }
 0x1b1   :  { %vm176_vm1 = vcmp.ge.f32.partialorder %v171_v33, 0.0  ;;  %v177_v36 = vmul.f32 0.2, %v171_v33  ;;  %v1178_v37 = vpop.f32.mrb[3].mxu0  ;;  %v1382_v35 = vld [vmem:[#allocation5 + $0x1a8] sm:$0xff]  }
 0x1b3   :  { %v178_v38 = vsel %vm176_vm1, %v171_v33, %v177_v36  ;;  %v1380_v33 = vld [vmem:[#allocation5 + $0x198] sm:$0xff]   ;;  %v1051_v36 = vld [vmem:[#allocation7 + $0x4] ss:$0 sm:$0xff] }
 0x1b4   :  { %v198_v39 = vpack.c.bf16 %v178_v38, %v178_v38 }
 0x1b6   :  { %1196 = vmatmul.mubr.bf16.vlgmr.msra.gmra.mrb[0].mxu1 %v198_v39 }
 0x1b7   :  { %1235 = vmatprep.mubr.msk.bf16.mxu1 %vm1497_vm0, %v1496_v0  ;;  %1220 = vmatpush3.bf16.msra.mxu1 %v1353_v42 }
 0x1b8   :  { %1221 = vmatprep.subr.bf16.mxu1 %v1496_v0 }
 0x1bb   :  { %1222 = vmatpush3.bf16.msra.mxu1 %v1354_v43 }
 0x1bc   :  { %1223 = vmatprep.subr.bf16.mxu1 %v1496_v0 }
 0x1bf   :  { %1224 = vmatpush3.bf16.msra.mxu1 %v1355_v44 }
 0x1c0   :  { %1225 = vmatprep.subr.bf16.mxu1 %v1496_v0 }
 0x1c3   :  { %1226 = vmatpush3.bf16.msra.mxu1 %v1356_v45  ;;  %v1383_v45 = vld [vmem:[#allocation5 + $0x1b0] sm:$0xff]  }
 0x1c4   :  { %1227 = vmatprep.subr.bf16.mxu1 %v1496_v0 }
 0x1c7   :  { %1228 = vmatpush3.bf16.msra.mxu1 %v1357_v46  ;;  %v1384_v46 = vld [vmem:[#allocation5 + $0x1b8] sm:$0xff]  }
 0x1c8   :  { %1229 = vmatprep.subr.bf16.mxu1 %v1496_v0 }
 0x1cb   :  { %1230 = vmatpush3.bf16.msra.mxu1 %v1358_v47  ;;  %v1385_v47 = vld [vmem:[#allocation5 + $0x1c0] sm:$0xff]  }
 0x1cc   :  { %1231 = vmatprep.subr.bf16.mxu1 %v1496_v0 }
 0x1cf   :  { %1232 = vmatpush3.bf16.msra.mxu1 %v1359_v57 }
 0x1d0   :  { %1233 = vmatprep.subr.bf16.mxu1 %v1496_v0 }
 0x1d3   :  { %1234 = vmatpush3.bf16.msra.mxu1 %v1360_v58 }
 0x1d4   :  { %1259 = vmatprep.subr.bf16.mxu1 %v1496_v0 }
 0x289   :  { %v287_v49 = vpop.f32.mrb[0].mxu1 }
 0x28a   :  { %v288_v50 = vadd.f32 %v1024_v48, %v287_v49  ;;  %v1197_v51 = vpop.f32.mrb[1].mxu1  ;;  %v1386_v48 = vld [vmem:[#allocation5 + $0x1c8] sm:$0xff]   ;;  %v1387_v49 = vld [vmem:[#allocation5 + $0x1d0] sm:$0xff]  }
 0x28b   :  { %v290_v52 = vpop.f32.mrb[2].mxu1  ;;  %v1389_v51 = vld [vmem:[#allocation5 + $0x1e0] sm:$0xff]  }
 0x28c   :  { %vm293_vm2 = vcmp.ge.f32.partialorder %v288_v50, 0.0  ;;  %v294_v53 = vmul.f32 0.2, %v288_v50  ;;  %v1198_v54 = vpop.f32.mrb[3].mxu1  ;;  %v1390_v52 = vld [vmem:[#allocation5 + $0x1e8] sm:$0xff]  }
 0x28e   :  { %v295_v55 = vsel %vm293_vm2, %v288_v50, %v294_v53  ;;  %v1388_v50 = vld [vmem:[#allocation5 + $0x1d8] sm:$0xff]   ;;  %v1060_v53 = vld [vmem:[#allocation7 + $0x5] ss:$0 sm:$0xff] }
 0x28f   :  { %v315_v56 = vpack.c.bf16 %v295_v55, %v295_v55 }
 0x291   :  { %1216 = vmatmul.mubr.bf16.vlgmr.msra.gmra.mrb[4].mxu0 %v315_v56 }
 0x292   :  { %1255 = vmatprep.mubr.msk.bf16.mxu0 %vm1497_vm0, %v1496_v0  ;;  %1240 = vmatpush3.bf16.msra.mxu0 %v1361_v59 }
 0x293   :  { %1241 = vmatprep.subr.bf16.mxu0 %v1496_v0 }
 0x296   :  { %1242 = vmatpush3.bf16.msra.mxu0 %v1362_v60 }
 0x297   :  { %1243 = vmatprep.subr.bf16.mxu0 %v1496_v0 }
 0x29a   :  { %1244 = vmatpush3.bf16.msra.mxu0 %v1363_v61 }
 0x29b   :  { %1245 = vmatprep.subr.bf16.mxu0 %v1496_v0 }
 0x29e   :  { %1246 = vmatpush3.bf16.msra.mxu0 %v1364_v62  ;;  %v1391_v62 = vld [vmem:[#allocation5 + $0x1f0] sm:$0xff]  }
 0x29f   :  { %1247 = vmatprep.subr.bf16.mxu0 %v1496_v0 }
 0x2a2   :  { %1248 = vmatpush3.bf16.msra.mxu0 %v1365_v63  ;;  %v1392_v63 = vld [vmem:[#allocation5 + $0x1f8] sm:$0xff]  }
 0x2a3   :  { %1249 = vmatprep.subr.bf16.mxu0 %v1496_v0 }
 0x2a6   :  { %1250 = vmatpush3.bf16.msra.mxu0 %v1366_v1  ;;  %v1069_v1 = vld [vmem:[#allocation7 + $0x6] ss:$0 sm:$0xff] }
 0x2a7   :  { %1251 = vmatprep.subr.bf16.mxu0 %v1496_v0 }
 0x2aa   :  { %1252 = vmatpush3.bf16.msra.mxu0 %v1367_v11 }
 0x2ab   :  { %1253 = vmatprep.subr.bf16.mxu0 %v1496_v0 }
 0x2ae   :  { %1254 = vmatpush3.bf16.msra.mxu0 %v1368_v12 }
 0x2af   :  { %1279 = vmatprep.subr.bf16.mxu0 %v1496_v0 }
 0x364   :  { %v404_v3 = vpop.f32.mrb[4].mxu0 }
 0x365   :  { %v405_v4 = vadd.f32 %v1033_v2, %v404_v3  ;;  %v1217_v5 = vpop.f32.mrb[5].mxu0 }
 0x366   :  { %v407_v6 = vpop.f32.mrb[6].mxu0 }
 0x367   :  { %vm410_vm3 = vcmp.ge.f32.partialorder %v405_v4, 0.0  ;;  %v411_v7 = vmul.f32 0.2, %v405_v4  ;;  %v1218_v8 = vpop.f32.mrb[7].mxu0 }
 0x369   :  { %v412_v9 = vsel %vm410_vm3, %v405_v4, %v411_v7 }
 0x36a   :  { %v432_v10 = vpack.c.bf16 %v412_v9, %v412_v9 }
 0x36c   :  { %1236 = vmatmul.mubr.bf16.vlgmr.msra.gmra.mrb[4].mxu1 %v432_v10  ;;  %v1078_v10 = vld [vmem:[#allocation7 + $0x7] ss:$0 sm:$0xff] }
 0x36d   :  { %1275 = vmatprep.mubr.msk.bf16.mxu1 %vm1497_vm0, %v1496_v0  ;;  %1260 = vmatpush3.bf16.msra.mxu1 %v1369_v13 }
 0x36e   :  { %1261 = vmatprep.subr.bf16.mxu1 %v1496_v0 }
 0x371   :  { %1262 = vmatpush3.bf16.msra.mxu1 %v1370_v14 }
 0x372   :  { %1263 = vmatprep.subr.bf16.mxu1 %v1496_v0 }
 0x375   :  { %1264 = vmatpush3.bf16.msra.mxu1 %v1371_v15 }
 0x376   :  { %1265 = vmatprep.subr.bf16.mxu1 %v1496_v0 }
 0x379   :  { %1266 = vmatpush3.bf16.msra.mxu1 %v1372_v16 }
 0x37a   :  { %1267 = vmatprep.subr.bf16.mxu1 %v1496_v0 }
 0x37d   :  { %1268 = vmatpush3.bf16.msra.mxu1 %v1373_v17 }
 0x37e   :  { %1269 = vmatprep.subr.bf16.mxu1 %v1496_v0 }
 0x381   :  { %1270 = vmatpush3.bf16.msra.mxu1 %v1374_v18 }
 0x382   :  { %1271 = vmatprep.subr.bf16.mxu1 %v1496_v0 }
 0x385   :  { %1272 = vmatpush3.bf16.msra.mxu1 %v1375_v28 }
 0x386   :  { %1273 = vmatprep.subr.bf16.mxu1 %v1496_v0 }
 0x389   :  { %1274 = vmatpush3.bf16.msra.mxu1 %v1376_v29 }
 0x38a   :  { %1299 = vmatprep.subr.bf16.mxu1 %v1496_v0 }
 0x43f   :  { %v521_v20 = vpop.f32.mrb[4].mxu1 }
 0x440   :  { %v522_v21 = vadd.f32 %v1042_v19, %v521_v20  ;;  %v1237_v22 = vpop.f32.mrb[5].mxu1 }
 0x441   :  { %v524_v23 = vpop.f32.mrb[6].mxu1 }
 0x442   :  { %vm527_vm4 = vcmp.ge.f32.partialorder %v522_v21, 0.0  ;;  %v528_v24 = vmul.f32 0.2, %v522_v21  ;;  %v1238_v25 = vpop.f32.mrb[7].mxu1 }
 0x444   :  { %v529_v26 = vsel %vm527_vm4, %v522_v21, %v528_v24 }
 0x445   :  { %v549_v27 = vpack.c.bf16 %v529_v26, %v529_v26 }
 0x447   :  { %1256 = vmatmul.mubr.bf16.vlgmr.msra.gmra.mrb[8].mxu0 %v549_v27 }
 0x448   :  { %1295 = vmatprep.mubr.msk.bf16.mxu0 %vm1497_vm0, %v1496_v0  ;;  %1280 = vmatpush3.bf16.msra.mxu0 %v1377_v30 }
 0x449   :  { %1281 = vmatprep.subr.bf16.mxu0 %v1496_v0 }
 0x44c   :  { %1282 = vmatpush3.bf16.msra.mxu0 %v1378_v31 }
 0x44d   :  { %1283 = vmatprep.subr.bf16.mxu0 %v1496_v0 }
 0x450   :  { %1284 = vmatpush3.bf16.msra.mxu0 %v1379_v32 }
 0x451   :  { %1285 = vmatprep.subr.bf16.mxu0 %v1496_v0 }
 0x454   :  { %1286 = vmatpush3.bf16.msra.mxu0 %v1380_v33 }
 0x455   :  { %1287 = vmatprep.subr.bf16.mxu0 %v1496_v0 }
 0x458   :  { %1288 = vmatpush3.bf16.msra.mxu0 %v1381_v34 }
 0x459   :  { %1289 = vmatprep.subr.bf16.mxu0 %v1496_v0 }
 0x45c   :  { %1290 = vmatpush3.bf16.msra.mxu0 %v1382_v35 }
 0x45d   :  { %1291 = vmatprep.subr.bf16.mxu0 %v1496_v0 }
 0x460   :  { %1292 = vmatpush3.bf16.msra.mxu0 %v1383_v45 }
 0x461   :  { %1293 = vmatprep.subr.bf16.mxu0 %v1496_v0 }
 0x464   :  { %1294 = vmatpush3.bf16.msra.mxu0 %v1384_v46 }
 0x51a   :  { %v638_v37 = vpop.f32.mrb[8].mxu0 }
 0x51b   :  { %v639_v38 = vadd.f32 %v1051_v36, %v638_v37  ;;  %v1257_v39 = vpop.f32.mrb[9].mxu0 }
 0x51c   :  { %v641_v40 = vpop.f32.mrb[10].mxu0 }
 0x51d   :  { %vm644_vm5 = vcmp.ge.f32.partialorder %v639_v38, 0.0  ;;  %v645_v41 = vmul.f32 0.2, %v639_v38  ;;  %v1258_v42 = vpop.f32.mrb[11].mxu0 }
 0x51f   :  { %v646_v43 = vsel %vm644_vm5, %v639_v38, %v645_v41 }
 0x520   :  { %v666_v44 = vpack.c.bf16 %v646_v43, %v646_v43 }
 0x522   :  { %1276 = vmatmul.mubr.bf16.vlgmr.msra.gmra.mrb[8].mxu1 %v666_v44 }
 0x523   :  { %1315 = vmatprep.mubr.msk.bf16.mxu1 %vm1497_vm0, %v1496_v0  ;;  %1300 = vmatpush3.bf16.msra.mxu1 %v1385_v47 }
 0x524   :  { %1301 = vmatprep.subr.bf16.mxu1 %v1496_v0 }
 0x527   :  { %1302 = vmatpush3.bf16.msra.mxu1 %v1386_v48 }
 0x528   :  { %1303 = vmatprep.subr.bf16.mxu1 %v1496_v0 }
 0x52b   :  { %1304 = vmatpush3.bf16.msra.mxu1 %v1387_v49 }
 0x52c   :  { %1305 = vmatprep.subr.bf16.mxu1 %v1496_v0 }
 0x52f   :  { %1306 = vmatpush3.bf16.msra.mxu1 %v1388_v50 }
 0x530   :  { %1307 = vmatprep.subr.bf16.mxu1 %v1496_v0 }
 0x533   :  { %1308 = vmatpush3.bf16.msra.mxu1 %v1389_v51 }
 0x534   :  { %1309 = vmatprep.subr.bf16.mxu1 %v1496_v0 }
 0x537   :  { %1310 = vmatpush3.bf16.msra.mxu1 %v1390_v52 }
 0x538   :  { %1311 = vmatprep.subr.bf16.mxu1 %v1496_v0 }
 0x53b   :  { %1312 = vmatpush3.bf16.msra.mxu1 %v1391_v62 }
 0x53c   :  { %1313 = vmatprep.subr.bf16.mxu1 %v1496_v0 }
 0x53f   :  { %1314 = vmatpush3.bf16.msra.mxu1 %v1392_v63 }
 0x5f5   :  { %v755_v54 = vpop.f32.mrb[8].mxu1 }
 0x5f6   :  { %v756_v55 = vadd.f32 %v1060_v53, %v755_v54  ;;  %v1277_v56 = vpop.f32.mrb[9].mxu1 }
 0x5f7   :  { %v758_v57 = vpop.f32.mrb[10].mxu1 }
 0x5f8   :  { %vm761_vm6 = vcmp.ge.f32.partialorder %v756_v55, 0.0  ;;  %v762_v58 = vmul.f32 0.2, %v756_v55  ;;  %v1278_v59 = vpop.f32.mrb[11].mxu1 }
 0x5fa   :  { %v763_v60 = vsel %vm761_vm6, %v756_v55, %v762_v58 }
 0x5fb   :  { %v783_v61 = vpack.c.bf16 %v763_v60, %v763_v60 }
 0x5fd   :  { %1296 = vmatmul.mubr.bf16.vlgmr.msra.gmra.mrb[12].mxu0 %v783_v61 }
 0x6d0   :  { %v872_v2 = vpop.f32.mrb[12].mxu0 }
 0x6d1   :  { %v873_v3 = vadd.f32 %v1069_v1, %v872_v2  ;;  %v1297_v4 = vpop.f32.mrb[13].mxu0 }
 0x6d2   :  { %v875_v5 = vpop.f32.mrb[14].mxu0 }
 0x6d3   :  { %vm878_vm7 = vcmp.ge.f32.partialorder %v873_v3, 0.0  ;;  %v879_v6 = vmul.f32 0.2, %v873_v3  ;;  %v1298_v7 = vpop.f32.mrb[15].mxu0 }
 0x6d5   :  { %v880_v8 = vsel %vm878_vm7, %v873_v3, %v879_v6 }
 0x6d6   :  { %v900_v9 = vpack.c.bf16 %v880_v8, %v880_v8 }
 0x6d8   :  { %1316 = vmatmul.mubr.bf16.vlgmr.msra.gmra.mrb[12].mxu1 %v900_v9 }
 0x7ab   :  { %v989_v11 = vpop.f32.mrb[12].mxu1 }
 0x7ac   :  { %v990_v12 = vadd.f32 %v1078_v10, %v989_v11  ;;  %v1317_v13 = vpop.f32.mrb[13].mxu1 }
 0x7ad   :  { %v992_v0 = vpop.f32.mrb[14].mxu1 }
 0x7ae   :  { %v996_v14 = vmul.f32 0.2, %v990_v12  ;;  %v1318_v15 = vpop.f32.mrb[15].mxu1  ;;  %vm995_vm8 = vcmp.ge.f32.partialorder %v990_v12, 0.0 }
 0x7b0   :  { %v997_v16 = vsel %vm995_vm8, %v990_v12, %v996_v14 }
 0x7b1   :  { %998 = vst [vmem:[#allocation8] sm:$0xff] %v997_v16 }
 0x7b2   :  { %1472 = shalt.err (!%p1469_p0)
}
 0x7b3   :  { %s1473_s27 = scalar_lea.hbm %s1650_s3, 128 }
 0x7b4   :  { %p1474_p1 = scmp.ne.s32.totalorder %s1650_s3, %s1473_s27  ;;  %p1477_p2 = scmp.lt.u32.totalorder %s1473_s27, %s1650_s3 }
 0x7b6   :  { %p1479_p3 = pnand %p1477_p2, %p1474_p1 }
 0x7b8   :  { %1482 = shalt.err (!%p1479_p3)
}
 0x7b9   :  { %1008 = dma.vmem_to_hbm [thread:$0]  %s1006_s23, 128, %s1650_s3, [#allocation4]  }
 0x7ba   :  { %1487 = dma.done.wait [#allocation4], 128  }
 0x7bb   :  { %1488 = vsyncadd [#allocation4], 4294967168 }
 0x7bc   :  { %1012 = vsyncpa [#allocation3], 1 }
 0x7bd   :  { %1013 = vsyncpa [#allocation6], 1 }
 0x7be   :  { %1014 = vsyncpa [#allocation4], 1 }

</bundles_post_ra>
